<compile_context>
chip_gen: v7x
topology: tpu7x:2x2x1
jax: 0.10.0
libtpu: 0.0.40
codegen_flags: <defaults>
</compile_context>

<pallas_src>
import jax
import jax.numpy as jnp
from jax.experimental import pallas as pl
from jax.experimental.pallas import tpu as pltpu


def _round_up(a: int, b: int) -> int:
    return ((a + b - 1) // b) * b


def _pad_cast(a, shape, dtype):
    """Cast and (only if necessary) zero-pad `a` up to `shape`."""
    a = a.astype(dtype)
    if tuple(a.shape) == tuple(shape):
        return a
    return jnp.zeros(shape, dtype).at[tuple(slice(0, s) for s in a.shape)].set(a)


def _resident_spec(block_shape, single_buffer: bool):
    """Constant-index (VMEM-resident) BlockSpec; single-buffer when big."""
    index_map = lambda i, k: (0,) * len(block_shape)
    if single_buffer:
        try:
            return pl.BlockSpec(block_shape, index_map,
                                pipeline_mode=pl.Buffered(1))
        except TypeError:      # older jax without pipeline_mode kwarg
            pass
    return pl.BlockSpec(block_shape, index_map)


def ib_irm_kernel(dmul_ref, dsum_ref, x_ref, wbT_ref, wcT_ref, bc_ref,
                  o_ref, acc_ref):
    # x_ref:   (tm, tk)   VMEM bf16   (batch tile, K tile of features)
    # wbT_ref: (tk, Fp)   VMEM bf16   (backbone weight K-slab or resident)
    # wcT_ref: (Fp, Op)   VMEM bf16   (classifier weight, resident)
    # bc_ref:  (1,  Op)   VMEM f32    (classifier bias, resident)
    # o_ref:   (tm, Op)   VMEM f32
    # acc_ref: (tm, Fp)   VMEM f32 scratch (backbone accumulator)
    # dmul_ref / dsum_ref: (1,) SMEM f32 scalars (IRM dummies)
    k = pl.program_id(1)

    @pl.when(k == 0)
    def _():
        acc_ref[...] = jnp.zeros_like(acc_ref)

    acc_ref[...] += jnp.dot(x_ref[...], wbT_ref[...],
                            preferred_element_type=jnp.float32)

    @pl.when(k == pl.num_programs(1) - 1)
    def _():
        h = acc_ref[...].astype(jnp.bfloat16)
        z = jnp.dot(h, wcT_ref[...],
                    preferred_element_type=jnp.float32) + bc_ref[...]
        # IRM dummy epilogue kept in-kernel: rides in MXU/store slack.
        o_ref[...] = (z * dmul_ref[0] + dsum_ref[0]).astype(o_ref.dtype)


@jax.jit
def ib_irm_forward(x, wb, wc, bc, dummy_mul, dummy_sum):
    """x: (B, F) f32; wb: (F, F); wc: (O, F); bc: (O,); dummies: scalars."""
    B, F = x.shape
    O = wc.shape[0]

    # ---- generation-aware VMEM budget ----
    try:
        vmem_cap = int(pltpu.get_tpu_info().vmem_capacity_bytes)
    except Exception:
        vmem_cap = 64 * 1024 * 1024          # conservative (v7x) fallback
    vmem_limit = int(vmem_cap * 0.8)         # headroom for Mosaic scratch
    big_vmem = vmem_cap >= 96 * 1024 * 1024  # v5e/v6e (128 MiB) vs v7x (64 MiB)

    # ---- hardware-friendly padded dims (lanes = 128) ----
    Fp = _round_up(F, 128)
    Op = _round_up(O, 128)

    # ---- batch tiling ----
    # >= 2 tiles for B > 16 (v7x megacore); accumulator (tm, Fp) f32 capped.
    tm_cap = 1024 if big_vmem else 512
    acc_cap = vmem_cap // 4
    tm_cap = max(8, min(tm_cap, (acc_cap // (Fp * 4)) // 8 * 8))
    min_tiles = 2 if B > 16 else 1
    n_bt = max(min_tiles, pl.cdiv(B, tm_cap))
    tm = _round_up(pl.cdiv(B, n_bt), 8)
    Bp = tm * n_bt

    # ---- K tiling over the backbone contraction dim ----
    # If the whole (Fp, Fp) backbone weight fits comfortably, keep it resident
    # (read from HBM exactly once); else stream K-slabs with tk | Fp.
    wbT_bytes = Fp * Fp * 2
    wbT_resident = wbT_bytes <= min(32 * 1024 * 1024, vmem_limit // 3)
    if wbT_resident:
        tk = Fp
    else:
        tk = 128
        for cand in (512, 256, 128):
            if Fp % cand == 0:
                tk = cand
                break
    grid = (Bp // tm, Fp // tk)

    # ---- glue: cast / transpose, pad only if needed ----
    x_p = _pad_cast(x, (Bp, Fp), jnp.bfloat16)
    wbT = _pad_cast(wb.T, (Fp, Fp), jnp.bfloat16)
    wcT = _pad_cast(wc.T, (Fp, Op), jnp.bfloat16)
    bc2 = _pad_cast(bc.reshape(1, -1), (1, Op), jnp.float32)
    dmul = jnp.asarray(dummy_mul, jnp.float32).reshape(1)
    dsum = jnp.asarray(dummy_sum, jnp.float32).reshape(1)

    # ---- BlockSpecs ----
    single_buf_thresh = 512 * 1024  # only bother below this? no: above this
    if wbT_resident:
        wbT_spec = _resident_spec((Fp, Fp), wbT_bytes >= single_buf_thresh)
    else:
        wbT_spec = pl.BlockSpec((tk, Fp), lambda i, k: (k, 0))
    wcT_spec = _resident_spec((Fp, Op), Fp * Op * 2 >= single_buf_thresh)
    bc_spec = _resident_spec((1, Op), False)

    # ---- cost estimate (wbT re-streamed per batch tile unless resident) ----
    wbT_hbm_reads = wbT.size * 2 * (1 if wbT_resident else (Bp // tm))
    cost = pl.CostEstimate(
        flops=2 * Bp * Fp * Fp + 2 * Bp * Fp * Op,
        transcendentals=0,
        bytes_accessed=(x_p.size * 2 + wbT_hbm_reads + wcT.size * 2
                        + bc2.size * 4 + Bp * Op * 4),
    )

    out_padded = pl.pallas_call(
        ib_irm_kernel,
        out_shape=jax.ShapeDtypeStruct((Bp, Op), jnp.float32),
        grid_spec=pltpu.PrefetchScalarGridSpec(
            num_scalar_prefetch=0,
            grid=grid,
            in_specs=[
                pl.BlockSpec(memory_space=pltpu.MemorySpace.SMEM),  # dummy_mul
                pl.BlockSpec(memory_space=pltpu.MemorySpace.SMEM),  # dummy_sum
                pl.BlockSpec((tm, tk), lambda i, k: (i, k)),        # x tile
                wbT_spec,                                           # backbone W
                wcT_spec,                                           # classifier W
                bc_spec,                                            # classifier b
            ],
            out_specs=pl.BlockSpec((tm, Op), lambda i, k: (i, 0)),
            scratch_shapes=[pltpu.VMEM((tm, Fp), jnp.float32)],
        ),
        compiler_params=pltpu.CompilerParams(
            dimension_semantics=("parallel", "arbitrary"),
            vmem_limit_bytes=vmem_limit,
        ),
        cost_estimate=cost,
    )(dmul, dsum, x_p, wbT, wcT, bc2)

    return out_padded[:B, :O]


def init_params(key, in_features, out_features):
    """Shapes/init matching PyTorch Linear's uniform(-1/sqrt(fan_in), ...)."""
    kb, kc, kcb = jax.random.split(key, 3)
    bound = 1.0 / jnp.sqrt(in_features)
    wb = jax.random.uniform(kb, (in_features, in_features), jnp.float32,
                            -bound, bound)
    wc = jax.random.uniform(kc, (out_features, in_features), jnp.float32,
                            -bound, bound)
    bc = jax.random.uniform(kcb, (out_features,), jnp.float32, -bound, bound)
    dummy_mul = jnp.float32(1.0)   # IRMLayer dummy_mul init
    dummy_sum = jnp.float32(0.0)   # IRMLayer dummy_sum init
    return wb, wc, bc, dummy_mul, dummy_sum


if __name__ == "__main__":
    key = jax.random.PRNGKey(0)
    kx, kp = jax.random.split(key)

    batch = 8
    in_features = 32
    out_features = 4   # multi-class logits (binary classification -> 1)

    x = jax.random.normal(kx, (batch, in_features), dtype=jnp.float32)
    wb, wc, bc, dmul, dsum = init_params(kp, in_features, out_features)

    out = ib_irm_forward(x, wb, wc, bc, dmul, dsum)
    out = jax.block_until_ready(out)
    assert out.shape == (batch, out_features)

    # Reference 1: same bf16-on-MXU compute path (tight check of the kernel).
    xb = x.astype(jnp.bfloat16)
    h_bf = jnp.dot(xb, wb.T.astype(jnp.bfloat16),
                   preferred_element_type=jnp.float32)
    z_bf = jnp.dot(h_bf.astype(jnp.bfloat16), wc.T.astype(jnp.bfloat16),
                   preferred_element_type=jnp.float32) + bc
    ref_bf16 = z_bf * dmul + dsum
    assert jnp.allclose(out, ref_bf16, atol=1e-3, rtol=1e-3), \
        "mismatch vs bf16-path reference"

    # Reference 2: true f32 PyTorch-Linear semantics (loose tolerance check of
    # the bf16 deviation flagged in review).
    ref_f32 = (jnp.dot(jnp.dot(x, wb.T), wc.T) + bc) * dmul + dsum
    assert jnp.allclose(out, ref_f32, atol=5e-2, rtol=5e-2), \
        "mismatch vs f32 reference"

    print("KERNEL_OK")
</pallas_src>

<mosaic_0001>
module attributes {stable_mosaic.version = 11 : i64} {
  func.func @ib_irm_kernel(%arg0: i32, %arg1: i32, %arg2: memref<1xf32, #tpu.memory_space<smem>>, %arg3: memref<1xf32, #tpu.memory_space<smem>>, %arg4: memref<8x128xbf16, #tpu.memory_space<vmem>>, %arg5: memref<128x128xbf16, #tpu.memory_space<vmem>>, %arg6: memref<128x128xbf16, #tpu.memory_space<vmem>>, %arg7: memref<1x128xf32, #tpu.memory_space<vmem>>, %arg8: memref<8x128xf32, #tpu.memory_space<vmem>>, %arg9: memref<8x128xf32, #tpu.memory_space<vmem>>) attributes {dimension_semantics = [#tpu.dimension_semantics<parallel>, #tpu.dimension_semantics<arbitrary>], iteration_bounds = array<i64: 1, 1>, scalar_prefetch = 0 : i64, scratch_operands = 1 : i64, tpu.core_type = #tpu.core_type<tc>, window_params = [{transform_indices = @transform_0, window_bounds = array<i64: 1>}, {transform_indices = @transform_1, window_bounds = array<i64: 1>}, {transform_indices = @transform_2, window_bounds = array<i64: 8, 128>}, {pipeline_mode = #tpu.pipeline_mode<synchronous>, transform_indices = @transform_3, window_bounds = array<i64: 128, 128>}, {pipeline_mode = #tpu.pipeline_mode<synchronous>, transform_indices = @transform_4, window_bounds = array<i64: 128, 128>}, {pipeline_mode = #tpu.pipeline_mode<synchronous>, transform_indices = @transform_5, window_bounds = array<i64: 1, 128>}, {transform_indices = @transform_6, window_bounds = array<i64: 8, 128>}]} {
    %c0_i32 = arith.constant 0 : i32
    %0 = arith.cmpi eq, %arg1, %c0_i32 : i32
    %1 = arith.extui %0 : i1 to i32
    %c0_i32_0 = arith.constant 0 : i32
    %2 = arith.cmpi ne, %1, %c0_i32_0 : i32
    scf.if %2 {
      %cst_10 = arith.constant 0.000000e+00 : f32
      %12 = vector.broadcast %cst_10 : f32 to vector<8x128xf32>
      %c0_11 = arith.constant 0 : index
      %c0_12 = arith.constant 0 : index
      %13 = vector.load %arg9[%c0_11, %c0_12] : memref<8x128xf32, #tpu.memory_space<vmem>>, vector<8x128xf32>
      tpu.vector_store %arg9[%c0_11, %c0_12], %12 {strides = array<i32>} : memref<8x128xf32, #tpu.memory_space<vmem>>, vector<8x128xf32>,
    } else {
    }
    %c0 = arith.constant 0 : index
    %c0_1 = arith.constant 0 : index
    %3 = vector.load %arg9[%c0, %c0_1] : memref<8x128xf32, #tpu.memory_space<vmem>>, vector<8x128xf32>
    %c0_2 = arith.constant 0 : index
    %c0_3 = arith.constant 0 : index
    %4 = vector.load %arg4[%c0_2, %c0_3] : memref<8x128xbf16, #tpu.memory_space<vmem>>, vector<8x128xbf16>
    %c0_4 = arith.constant 0 : index
    %c0_5 = arith.constant 0 : index
    %5 = vector.load %arg5[%c0_4, %c0_5] : memref<128x128xbf16, #tpu.memory_space<vmem>>, vector<128x128xbf16>
    %cst = arith.constant dense<0.000000e+00> : vector<8x128xf32>
    %6 = tpu.matmul %4, %5, %cst {dimension_numbers = #tpu.dot_dimension_numbers<[1], [0], [0], [1], [0, 0, 1, 1], [], []>} : vector<8x128xbf16>, vector<128x128xbf16>, vector<8x128xf32> -> vector<8x128xf32>
    %7 = arith.addf %3, %6 : vector<8x128xf32>
    %c0_6 = arith.constant 0 : index
    %c0_7 = arith.constant 0 : index
    %8 = vector.load %arg9[%c0_6, %c0_7] : memref<8x128xf32, #tpu.memory_space<vmem>>, vector<8x128xf32>
    tpu.vector_store %arg9[%c0_6, %c0_7], %7 {strides = array<i32>} : memref<8x128xf32, #tpu.memory_space<vmem>>, vector<8x128xf32>,
    %c0_i32_8 = arith.constant 0 : i32
    %9 = arith.cmpi eq, %arg1, %c0_i32_8 : i32
    %10 = arith.extui %9 : i1 to i32
    %c0_i32_9 = arith.constant 0 : i32
    %11 = arith.cmpi ne, %10, %c0_i32_9 : i32
    scf.if %11 {
      %c0_10 = arith.constant 0 : index
      %c0_11 = arith.constant 0 : index
      %12 = vector.load %arg9[%c0_10, %c0_11] : memref<8x128xf32, #tpu.memory_space<vmem>>, vector<8x128xf32>
      %13 = arith.truncf %12 : vector<8x128xf32> to vector<8x128xbf16>
      %c0_12 = arith.constant 0 : index
      %c0_13 = arith.constant 0 : index
      %14 = vector.load %arg6[%c0_12, %c0_13] : memref<128x128xbf16, #tpu.memory_space<vmem>>, vector<128x128xbf16>
      %cst_14 = arith.constant dense<0.000000e+00> : vector<8x128xf32>
      %15 = tpu.matmul %13, %14, %cst_14 {dimension_numbers = #tpu.dot_dimension_numbers<[1], [0], [0], [1], [0, 0, 1, 1], [], []>} : vector<8x128xbf16>, vector<128x128xbf16>, vector<8x128xf32> -> vector<8x128xf32>
      %c0_15 = arith.constant 0 : index
      %c0_16 = arith.constant 0 : index
      %16 = vector.load %arg7[%c0_15, %c0_16] : memref<1x128xf32, #tpu.memory_space<vmem>>, vector<1x128xf32>
      %17 = vector.broadcast %16 : vector<1x128xf32> to vector<8x128xf32>
      %18 = arith.addf %15, %17 : vector<8x128xf32>
      %c0_17 = arith.constant 0 : index
      %19 = memref.load %arg2[%c0_17] : memref<1xf32, #tpu.memory_space<smem>>
      %20 = vector.broadcast %19 : f32 to vector<8x128xf32>
      %21 = arith.mulf %18, %20 : vector<8x128xf32>
      %c0_18 = arith.constant 0 : index
      %22 = memref.load %arg3[%c0_18] : memref<1xf32, #tpu.memory_space<smem>>
      %23 = vector.broadcast %22 : f32 to vector<8x128xf32>
      %24 = arith.addf %21, %23 : vector<8x128xf32>
      %c0_19 = arith.constant 0 : index
      %c0_20 = arith.constant 0 : index
      %25 = vector.load %arg8[%c0_19, %c0_20] : memref<8x128xf32, #tpu.memory_space<vmem>>, vector<8x128xf32>
      tpu.vector_store %arg8[%c0_19, %c0_20], %24 {strides = array<i32>} : memref<8x128xf32, #tpu.memory_space<vmem>>, vector<8x128xf32>,
    } else {
    }
    return
  }
  func.func @transform_0(%arg0: i32, %arg1: i32) -> i32 {
    %c0_i32 = arith.constant 0 : i32
    %c0_i32_0 = arith.constant 0 : i32
    return %c0_i32 : i32
  }
  func.func @transform_1(%arg0: i32, %arg1: i32) -> i32 {
    %c0_i32 = arith.constant 0 : i32
    %c0_i32_0 = arith.constant 0 : i32
    return %c0_i32 : i32
  }
  func.func @transform_2(%arg0: i32, %arg1: i32) -> (i32, i32) {
    %c0_i32 = arith.constant 0 : i32
    return %arg0, %arg1 : i32, i32
  }
  func.func @transform_3(%arg0: i32, %arg1: i32) -> (i32, i32) {
    %c0_i32 = arith.constant 0 : i32
    %c0_i32_0 = arith.constant 0 : i32
    %c0_i32_1 = arith.constant 0 : i32
    return %c0_i32, %c0_i32_0 : i32, i32
  }
  func.func @transform_4(%arg0: i32, %arg1: i32) -> (i32, i32) {
    %c0_i32 = arith.constant 0 : i32
    %c0_i32_0 = arith.constant 0 : i32
    %c0_i32_1 = arith.constant 0 : i32
    return %c0_i32, %c0_i32_0 : i32, i32
  }
  func.func @transform_5(%arg0: i32, %arg1: i32) -> (i32, i32) {
    %c0_i32 = arith.constant 0 : i32
    %c0_i32_0 = arith.constant 0 : i32
    %c0_i32_1 = arith.constant 0 : i32
    return %c0_i32, %c0_i32_0 : i32, i32
  }
  func.func @transform_6(%arg0: i32, %arg1: i32) -> (i32, i32) {
    %c0_i32 = arith.constant 0 : i32
    %c0_i32_0 = arith.constant 0 : i32
    return %arg0, %c0_i32 : i32, i32
  }
}

</mosaic_0001>

<bundles_post_ra>
// kernel: ib_irm_forward.1
= control target key start
LH: loop header
LB: loop body
LE: loop exit
PB: predicated region body
PF: predicated region fallthrough
CT: control target
= control target key end

     0   :  { %v359_v0 = vmov 0.0   ;;  %vm360_vm0 = vmmov 0   ;;  %s459_s3 = inlined_call_operand.vmem [shape: bf16[128,128], index: 3, kind: input, shape index: {}]   ;;  %s460_s4 = inlined_call_operand.vmem [shape: bf16[128,128], index: 4, kind: input, shape index: {}]   ;;  %s461_s2 = inlined_call_operand.vmem [shape: bf16[8,128], index: 2, kind: input, shape index: {}]   ;;  %s462_s5 = inlined_call_operand.vmem [shape: f32[1,128], index: 5, kind: input, shape index: {}]   ;;  %s463_s0 = inlined_call_operand.<no memory space> [shape: f32[1], index: 0, kind: input, shape index: {}]   ;;  %s464_s1 = inlined_call_operand.<no memory space> [shape: f32[1], index: 1, kind: input, shape index: {}]   ;;  %s465_s6 = inlined_call_operand.vmem [shape: f32[8,128], index: 6, kind: output, shape index: {}]  }
   0x1   :  { %301 = vmatprep.subr.bf16.mxu0 %v359_v0  ;;  %v343_v1 = vld [vmem:[%s459_s3] sm:$0xff]   ;;  %317 = vmatprep.mubr.msk.bf16.mxu0 %vm360_vm0, %v359_v0  ;;  %v344_v2 = vld [vmem:[%s459_s3 + $0x8] sm:$0xff]   ;;  %v345_v3 = vld [vmem:[%s459_s3 + $0x10] sm:$0xff]   ;;  %v256_v25 = vstv %s463_s0 }
   0x2   :  { %321 = vmatprep.subr.bf16.mxu1 %v359_v0  ;;  %337 = vmatprep.mubr.msk.bf16.mxu1 %vm360_vm0, %v359_v0  ;;  %v351_v4 = vld [vmem:[%s460_s4] sm:$0xff]   ;;  %v346_v5 = vld [vmem:[%s459_s3 + $0x18] sm:$0xff]   ;;  %v352_v6 = vld [vmem:[%s460_s4 + $0x8] sm:$0xff]   ;;  %v259_v28 = vstv %s464_s1 }
   0x3   :  { %302 = vmatpush3.bf16.msra.mxu0 %v343_v1  ;;  %322 = vmatpush3.bf16.msra.mxu1 %v351_v4  ;;  %v347_v7 = vld [vmem:[%s459_s3 + $0x20] sm:$0xff]   ;;  %v353_v8 = vld [vmem:[%s460_s4 + $0x10] sm:$0xff]   ;;  %v348_v9 = vld [vmem:[%s459_s3 + $0x28] sm:$0xff]  }
   0x4   :  { %303 = vmatprep.subr.bf16.mxu0 %v359_v0  ;;  %323 = vmatprep.subr.bf16.mxu1 %v359_v0  ;;  %v354_v10 = vld [vmem:[%s460_s4 + $0x18] sm:$0xff]   ;;  %v349_v11 = vld [vmem:[%s459_s3 + $0x30] sm:$0xff]   ;;  %v355_v12 = vld [vmem:[%s460_s4 + $0x20] sm:$0xff]  }
   0x5   :  { %v350_v13 = vld [vmem:[%s459_s3 + $0x38] sm:$0xff]   ;;  %v356_v14 = vld [vmem:[%s460_s4 + $0x28] sm:$0xff]   ;;  %v32_v15 = vld [vmem:[%s461_s2] sm:$0xf] }
   0x6   :  { %v357_v16 = vld [vmem:[%s460_s4 + $0x30] sm:$0xff]   ;;  %v358_v17 = vld [vmem:[%s460_s4 + $0x38] sm:$0xff]   ;;  %v274_v23 = vld [vmem:[%s462_s5] ss:$0 sm:$0xff] }
   0x7   :  { %304 = vmatpush3.bf16.msra.mxu0 %v344_v2  ;;  %324 = vmatpush3.bf16.msra.mxu1 %v352_v6 }
   0x8   :  { %305 = vmatprep.subr.bf16.mxu0 %v359_v0  ;;  %325 = vmatprep.subr.bf16.mxu1 %v359_v0 }
   0xb   :  { %306 = vmatpush3.bf16.msra.mxu0 %v345_v3  ;;  %326 = vmatpush3.bf16.msra.mxu1 %v353_v8 }
   0xc   :  { %307 = vmatprep.subr.bf16.mxu0 %v359_v0  ;;  %327 = vmatprep.subr.bf16.mxu1 %v359_v0 }
   0xf   :  { %308 = vmatpush3.bf16.msra.mxu0 %v346_v5  ;;  %328 = vmatpush3.bf16.msra.mxu1 %v354_v10 }
  0x10   :  { %309 = vmatprep.subr.bf16.mxu0 %v359_v0  ;;  %329 = vmatprep.subr.bf16.mxu1 %v359_v0 }
  0x13   :  { %310 = vmatpush3.bf16.msra.mxu0 %v347_v7  ;;  %330 = vmatpush3.bf16.msra.mxu1 %v355_v12 }
  0x14   :  { %311 = vmatprep.subr.bf16.mxu0 %v359_v0  ;;  %331 = vmatprep.subr.bf16.mxu1 %v359_v0 }
  0x17   :  { %312 = vmatpush3.bf16.msra.mxu0 %v348_v9  ;;  %332 = vmatpush3.bf16.msra.mxu1 %v356_v14 }
  0x18   :  { %313 = vmatprep.subr.bf16.mxu0 %v359_v0  ;;  %333 = vmatprep.subr.bf16.mxu1 %v359_v0 }
  0x1b   :  { %314 = vmatpush3.bf16.msra.mxu0 %v349_v11  ;;  %334 = vmatpush3.bf16.msra.mxu1 %v357_v16 }
  0x1c   :  { %315 = vmatprep.subr.bf16.mxu0 %v359_v0  ;;  %335 = vmatprep.subr.bf16.mxu1 %v359_v0 }
  0x1f   :  { %316 = vmatpush3.bf16.msra.mxu0 %v350_v13  ;;  %336 = vmatpush3.bf16.msra.mxu1 %v358_v17 }
  0x22   :  { %318 = vmatmul.mubr.bf16.vlgmr.msra.gmra.mrb[0].mxu0 %v32_v15 }
  0xf5   :  { %v131_v18 = vpop.f32.mrb[0].mxu0 }
  0xf6   :  { %v143_v19 = vpack.c.bf16 %v131_v18, %v131_v18  ;;  %v319_v20 = vpop.f32.mrb[1].mxu0 }
  0xf7   :  { %v134_v21 = vpop.f32.mrb[2].mxu0 }
  0xf8   :  { %v320_v22 = vpop.f32.mrb[3].mxu0  ;;  %338 = vmatmul.mubr.bf16.vlgmr.msra.gmra.mrb[0].mxu1 %v143_v19 }
 0x1cb   :  { %v249_v24 = vpop.f32.mrb[0].mxu1 }
 0x1cc   :  { %v250_v26 = vadd.f32 %v274_v23, %v249_v24  ;;  %v339_v27 = vpop.f32.mrb[1].mxu1 }
 0x1cd   :  { %v252_v29 = vpop.f32.mrb[2].mxu1 }
 0x1ce   :  { %v257_v30 = vmul.f32 %v256_v25, %v250_v26  ;;  %v340_v31 = vpop.f32.mrb[3].mxu1 }
 0x1d0   :  { %v260_v32 = vadd.f32 %v259_v28, %v257_v30 }
 0x1d2   :  { %261 = vst [vmem:[%s465_s6] sm:$0xff] %v260_v32 }

</bundles_post_ra>
